<compile_context>
chip_gen: v7x
topology: tpu7x:2x2x1
jax: 0.10.0
libtpu: 0.0.40
codegen_flags: <defaults>
</compile_context>

<pallas_src>
import functools

import jax
import jax.numpy as jnp
import numpy as np
from jax.experimental import pallas as pl
from jax.experimental.pallas import tpu as pltpu

NUM_SEGS = 8
NUM_CLASSES = 10
BACKBONE_CHANNELS = 32
KPAD = 128          # lane-dense logits width (>= NUM_CLASSES, multiple of 128)


def _round_up(x, m):
    return (x + m - 1) // m * m


# --------------------------------------------------------------------------
# Fused kernel: 3x3 SAME conv (9 shifted MXU matmuls) + bias + ReLU
#               + spatial GAP partial sum (accumulated over frames)
#               + on last frame: segment consensus + FC + lane-dense store.
# One grid step == one frame of one batch sample.
# --------------------------------------------------------------------------
def fused_recognizer_kernel(x_ref, m_ref, wct_ref, bc_ref, wf_ref, bf_ref,
                            o_ref, acc_ref, *, w, hw, inv_thw):
    # x_ref  : (1, 1, Cpad, FLAT) bf16  vertically padded, row-flattened frame
    # m_ref  : (2, HW) bf16             [left-edge mask, right-edge mask]
    # wct_ref: (9, COUT, Cpad) bf16     per-tap transposed conv weights (k=ky*3+kx)
    # bc_ref : (COUT, 1) f32            conv bias (broadcast over lanes)
    # wf_ref : (COUT, KPAD) f32         zero-padded cls-head FC weight
    # bf_ref : (1, KPAD) f32            zero-padded cls-head FC bias
    # o_ref  : (1, 1, KPAD) f32         logits (written on the last frame only)
    # acc_ref: (COUT, 1) f32 scratch    running GAP sum over this sample's frames
    t = pl.program_id(1)

    @pl.when(t == 0)
    def _():
        acc_ref[...] = jnp.zeros_like(acc_ref)

    masks = m_ref[...]                                   # (2, HW) bf16
    cout = wct_ref.shape[1]

    # 3x3 SAME conv as 9 statically-shifted bf16 MXU matmuls, f32 accumulate.
    act = jnp.zeros((cout, hw), jnp.float32)
    for ky in range(3):
        for kx in range(3):
            off = ky * w + kx                            # static flat shift
            sl = x_ref[0, 0, :, off:off + hw]            # (Cpad, HW) bf16
            if kx == 0:                                  # left-edge wrap -> 0
                sl = sl * masks[0:1, :]
            elif kx == 2:                                # right-edge wrap -> 0
                sl = sl * masks[1:2, :]
            act = act + jnp.dot(wct_ref[ky * 3 + kx], sl,
                                preferred_element_type=jnp.float32)

    act = jnp.maximum(act + bc_ref[...], 0.0)            # bias + ReLU (COUT, HW)
    # spatial GAP partial sum for this frame (lane-axis reduce)
    acc_ref[...] += jnp.sum(act, axis=1, keepdims=True)  # (COUT, 1)

    @pl.when(t == pl.num_programs(1) - 1)
    def _():
        # GAP + segment consensus == mean over num_segs*H*W (uniform counts)
        pooled = acc_ref[...] * inv_thw                  # (COUT, 1) f32
        # tiny FC as broadcast-multiply + sublane reduce: (1, KPAD), no transpose
        logits = jnp.sum(pooled * wf_ref[...], axis=0, keepdims=True) + bf_ref[...]
        o_ref[0] = logits                                # lane-dense store


# --------------------------------------------------------------------------
# WrappedRecognizer.forward equivalent.
# --------------------------------------------------------------------------
def wrapped_recognizer_forward(x, params, num_segs=NUM_SEGS):
    # x: (b, t, c, h, w) float32 (PyTorch NCHW per frame)
    b, t, c, h, w = x.shape
    n = b * t
    assert n % num_segs == 0
    bsz = n // num_segs
    hw = h * w
    cpad = _round_up(c, 4)                               # even/packed contraction dim
    flat = _round_up((h + 2) * w + 2, 128)               # lane-dense flat frame length
    cout = params["conv_w"].shape[-1]
    k = params["fc_w"].shape[-1]

    # ---- pre-pack: bf16 cast + channel pad + vertical SAME pad + row-flatten.
    # ~1x raw-input HBM traffic (bf16): the 9 conv taps are built in-kernel,
    # so there is no 9x im2col slab materialized in HBM.
    xb = x.astype(jnp.bfloat16).reshape(bsz, num_segs, c, h, w)
    xb = jnp.pad(xb, ((0, 0), (0, 0), (0, cpad - c), (0, 0), (0, 0)))
    xv = jnp.pad(xb, ((0, 0), (0, 0), (0, 0), (1, 1), (0, 0)))
    xf = xv.reshape(bsz, num_segs, cpad, (h + 2) * w)
    xf = jnp.pad(xf, ((0, 0), (0, 0), (0, 0), (1, flat - (h + 2) * w - 1)))

    # left/right edge masks (kill the horizontal wrap-around of the flat shifts)
    col = jnp.arange(hw, dtype=jnp.int32) % w
    masks = jnp.stack([(col != 0), (col != w - 1)], axis=0).astype(jnp.bfloat16)

    # conv weight: per-tap transposed (tap = ky*3+kx), channel-padded, bf16
    wct = jnp.transpose(params["conv_w"], (0, 1, 3, 2)).reshape(9, cout, c)
    wct = jnp.pad(wct, ((0, 0), (0, 0), (0, cpad - c))).astype(jnp.bfloat16)
    bc = params["conv_b"].reshape(cout, 1).astype(jnp.float32)
    # cls-head FC zero-padded to a lane-dense 128-wide output
    wf = jnp.zeros((cout, KPAD), jnp.float32).at[:, :k].set(params["fc_w"])
    bf = jnp.zeros((1, KPAD), jnp.float32).at[:, :k].set(params["fc_b"])

    kernel = functools.partial(fused_recognizer_kernel, w=w, hw=hw,
                               inv_thw=1.0 / float(num_segs * hw))

    out = pl.pallas_call(
        kernel,
        out_shape=jax.ShapeDtypeStruct((bsz, 1, KPAD), jnp.float32),
        grid=(bsz, num_segs),
        in_specs=[
            pl.BlockSpec((1, 1, cpad, flat), lambda i, s: (i, s, 0, 0)),
            pl.BlockSpec((2, hw), lambda i, s: (0, 0)),
            pl.BlockSpec((9, cout, cpad), lambda i, s: (0, 0, 0)),
            pl.BlockSpec((cout, 1), lambda i, s: (0, 0)),
            pl.BlockSpec((cout, KPAD), lambda i, s: (0, 0)),
            pl.BlockSpec((1, KPAD), lambda i, s: (0, 0)),
        ],
        out_specs=pl.BlockSpec((1, 1, KPAD), lambda i, s: (i, 0, 0)),
        scratch_shapes=[pltpu.VMEM((cout, 1), jnp.float32)],
        compiler_params=pltpu.CompilerParams(
            dimension_semantics=("parallel", "arbitrary"),
            vmem_limit_bytes=32 * 1024 * 1024),
    )(xf, masks, wct, bc, wf, bf)
    return out[:, 0, :k]                                 # (bsz, NUM_CLASSES)


# Pure-JAX f32 reference for a correctness sanity check.
def reference_forward(x, params, num_segs=NUM_SEGS):
    b, t, c, h, w = x.shape
    x = x.reshape(b * t, c, h, w)
    x_nhwc = jnp.transpose(x, (0, 2, 3, 1))
    y = jax.lax.conv_general_dilated(
        x_nhwc, params["conv_w"], window_strides=(1, 1), padding="SAME",
        dimension_numbers=("NHWC", "HWIO", "NHWC"))
    y = jax.nn.relu(y + params["conv_b"])
    pooled = y.mean(axis=(1, 2))                           # spatial GAP
    pooled = pooled.reshape(-1, num_segs, pooled.shape[-1]).mean(axis=1)
    return pooled @ params["fc_w"] + params["fc_b"]


if __name__ == "__main__":
    key = jax.random.PRNGKey(0)
    kx, kcw, kcb, kfw, kfb = jax.random.split(key, 5)

    b, t, c, h, w = 2, NUM_SEGS, 3, 16, 16
    x = jax.random.normal(kx, (b, t, c, h, w), jnp.float32)

    params = dict(
        conv_w=0.1 * jax.random.normal(kcw, (3, 3, c, BACKBONE_CHANNELS), jnp.float32),
        conv_b=0.1 * jax.random.normal(kcb, (BACKBONE_CHANNELS,), jnp.float32),
        fc_w=0.1 * jax.random.normal(kfw, (BACKBONE_CHANNELS, NUM_CLASSES), jnp.float32),
        fc_b=0.1 * jax.random.normal(kfb, (NUM_CLASSES,), jnp.float32),
    )

    out = jax.jit(wrapped_recognizer_forward)(x, params)
    out = jax.block_until_ready(out)

    assert out.shape == (b, NUM_CLASSES), out.shape
    ref = reference_forward(x, params)
    # bf16 matmul operands (per the perf review) -> looser tolerance vs f32 ref.
    np.testing.assert_allclose(np.asarray(out), np.asarray(ref),
                               rtol=2e-2, atol=2e-2)
    print("KERNEL_OK")
</pallas_src>

<mosaic_0001>
module attributes {stable_mosaic.version = 11 : i64} {
  func.func @fused_recognizer_kernel(%arg0: i32, %arg1: i32, %arg2: memref<1x1x4x384xbf16, #tpu.memory_space<vmem>>, %arg3: memref<2x256xbf16, #tpu.memory_space<vmem>>, %arg4: memref<9x32x4xbf16, #tpu.memory_space<vmem>>, %arg5: memref<32x1xf32, #tpu.memory_space<vmem>>, %arg6: memref<32x128xf32, #tpu.memory_space<vmem>>, %arg7: memref<1x128xf32, #tpu.memory_space<vmem>>, %arg8: memref<1x1x128xf32, #tpu.memory_space<vmem>>, %arg9: memref<32x1xf32, #tpu.memory_space<vmem>>) attributes {dimension_semantics = [#tpu.dimension_semantics<parallel>, #tpu.dimension_semantics<arbitrary>], iteration_bounds = array<i64: 2, 8>, scalar_prefetch = 0 : i64, scratch_operands = 1 : i64, tpu.core_type = #tpu.core_type<tc>, window_params = [{transform_indices = @transform_0, window_bounds = array<i64: 1, 1, 4, 384>}, {pipeline_mode = #tpu.pipeline_mode<synchronous>, transform_indices = @transform_1, window_bounds = array<i64: 2, 256>}, {pipeline_mode = #tpu.pipeline_mode<synchronous>, transform_indices = @transform_2, window_bounds = array<i64: 9, 32, 4>}, {pipeline_mode = #tpu.pipeline_mode<synchronous>, transform_indices = @transform_3, window_bounds = array<i64: 32, 1>}, {pipeline_mode = #tpu.pipeline_mode<synchronous>, transform_indices = @transform_4, window_bounds = array<i64: 32, 128>}, {pipeline_mode = #tpu.pipeline_mode<synchronous>, transform_indices = @transform_5, window_bounds = array<i64: 1, 128>}, {transform_indices = @transform_6, window_bounds = array<i64: 1, 1, 128>}]} {
    %c0_i32 = arith.constant 0 : i32
    %0 = arith.cmpi eq, %arg1, %c0_i32 : i32
    %1 = arith.extui %0 : i1 to i32
    %c0_i32_0 = arith.constant 0 : i32
    %2 = arith.cmpi ne, %1, %c0_i32_0 : i32
    scf.if %2 {
      %cst_69 = arith.constant 0.000000e+00 : f32
      %90 = vector.broadcast %cst_69 : f32 to vector<32x1xf32>
      %c0_70 = arith.constant 0 : index
      %c0_71 = arith.constant 0 : index
      %91 = vector.load %arg9[%c0_70, %c0_71] : memref<32x1xf32, #tpu.memory_space<vmem>>, vector<32x1xf32>
      tpu.vector_store %arg9[%c0_70, %c0_71], %90 {strides = array<i32>} : memref<32x1xf32, #tpu.memory_space<vmem>>, vector<32x1xf32>,
    } else {
    }
    %c0 = arith.constant 0 : index
    %c0_1 = arith.constant 0 : index
    %3 = vector.load %arg3[%c0, %c0_1] : memref<2x256xbf16, #tpu.memory_space<vmem>>, vector<2x256xbf16>
    %cst = arith.constant 0.000000e+00 : f32
    %4 = vector.broadcast %cst : f32 to vector<32x256xf32>
    %c0_2 = arith.constant 0 : index
    %c0_3 = arith.constant 0 : index
    %c0_4 = arith.constant 0 : index
    %c0_5 = arith.constant 0 : index
    %5 = vector.load %arg2[%c0_2, %c0_3, %c0_4, %c0_5] : memref<1x1x4x384xbf16, #tpu.memory_space<vmem>>, vector<1x1x4x256xbf16>
    %6 = vector.shape_cast %5 : vector<1x1x4x256xbf16> to vector<4x256xbf16>
    %7 = vector.extract_strided_slice %3 {offsets = [0, 0], sizes = [1, 256], strides = [1, 1]} : vector<2x256xbf16> to vector<1x256xbf16>
    %8 = vector.broadcast %7 : vector<1x256xbf16> to vector<4x256xbf16>
    %9 = arith.mulf %6, %8 : vector<4x256xbf16>
    %c0_6 = arith.constant 0 : index
    %c0_7 = arith.constant 0 : index
    %c0_8 = arith.constant 0 : index
    %10 = vector.load %arg4[%c0_6, %c0_7, %c0_8] : memref<9x32x4xbf16, #tpu.memory_space<vmem>>, vector<1x32x4xbf16>
    %11 = vector.shape_cast %10 : vector<1x32x4xbf16> to vector<32x4xbf16>
    %cst_9 = arith.constant dense<0.000000e+00> : vector<32x256xf32>
    %12 = tpu.matmul %11, %9, %cst_9 {dimension_numbers = #tpu.dot_dimension_numbers<[1], [0], [0], [1], [0, 0, 1, 1], [], []>} : vector<32x4xbf16>, vector<4x256xbf16>, vector<32x256xf32> -> vector<32x256xf32>
    %13 = arith.addf %4, %12 : vector<32x256xf32>
    %c0_10 = arith.constant 0 : index
    %c0_11 = arith.constant 0 : index
    %c0_12 = arith.constant 0 : index
    %c1 = arith.constant 1 : index
    %14 = vector.load %arg2[%c0_10, %c0_11, %c0_12, %c1] : memref<1x1x4x384xbf16, #tpu.memory_space<vmem>>, vector<1x1x4x256xbf16>
    %15 = vector.shape_cast %14 : vector<1x1x4x256xbf16> to vector<4x256xbf16>
    %c1_13 = arith.constant 1 : index
    %c0_14 = arith.constant 0 : index
    %c0_15 = arith.constant 0 : index
    %16 = vector.load %arg4[%c1_13, %c0_14, %c0_15] : memref<9x32x4xbf16, #tpu.memory_space<vmem>>, vector<1x32x4xbf16>
    %17 = vector.shape_cast %16 : vector<1x32x4xbf16> to vector<32x4xbf16>
    %cst_16 = arith.constant dense<0.000000e+00> : vector<32x256xf32>
    %18 = tpu.matmul %17, %15, %cst_16 {dimension_numbers = #tpu.dot_dimension_numbers<[1], [0], [0], [1], [0, 0, 1, 1], [], []>} : vector<32x4xbf16>, vector<4x256xbf16>, vector<32x256xf32> -> vector<32x256xf32>
    %19 = arith.addf %13, %18 : vector<32x256xf32>
    %c0_17 = arith.constant 0 : index
    %c0_18 = arith.constant 0 : index
    %c0_19 = arith.constant 0 : index
    %c2 = arith.constant 2 : index
    %20 = vector.load %arg2[%c0_17, %c0_18, %c0_19, %c2] : memref<1x1x4x384xbf16, #tpu.memory_space<vmem>>, vector<1x1x4x256xbf16>
    %21 = vector.shape_cast %20 : vector<1x1x4x256xbf16> to vector<4x256xbf16>
    %22 = vector.extract_strided_slice %3 {offsets = [1, 0], sizes = [1, 256], strides = [1, 1]} : vector<2x256xbf16> to vector<1x256xbf16>
    %23 = vector.broadcast %22 : vector<1x256xbf16> to vector<4x256xbf16>
    %24 = arith.mulf %21, %23 : vector<4x256xbf16>
    %c2_20 = arith.constant 2 : index
    %c0_21 = arith.constant 0 : index
    %c0_22 = arith.constant 0 : index
    %25 = vector.load %arg4[%c2_20, %c0_21, %c0_22] : memref<9x32x4xbf16, #tpu.memory_space<vmem>>, vector<1x32x4xbf16>
    %26 = vector.shape_cast %25 : vector<1x32x4xbf16> to vector<32x4xbf16>
    %cst_23 = arith.constant dense<0.000000e+00> : vector<32x256xf32>
    %27 = tpu.matmul %26, %24, %cst_23 {dimension_numbers = #tpu.dot_dimension_numbers<[1], [0], [0], [1], [0, 0, 1, 1], [], []>} : vector<32x4xbf16>, vector<4x256xbf16>, vector<32x256xf32> -> vector<32x256xf32>
    %28 = arith.addf %19, %27 : vector<32x256xf32>
    %c0_24 = arith.constant 0 : index
    %c0_25 = arith.constant 0 : index
    %c0_26 = arith.constant 0 : index
    %c16 = arith.constant 16 : index
    %29 = vector.load %arg2[%c0_24, %c0_25, %c0_26, %c16] : memref<1x1x4x384xbf16, #tpu.memory_space<vmem>>, vector<1x1x4x256xbf16>
    %30 = vector.shape_cast %29 : vector<1x1x4x256xbf16> to vector<4x256xbf16>
    %31 = vector.extract_strided_slice %3 {offsets = [0, 0], sizes = [1, 256], strides = [1, 1]} : vector<2x256xbf16> to vector<1x256xbf16>
    %32 = vector.broadcast %31 : vector<1x256xbf16> to vector<4x256xbf16>
    %33 = arith.mulf %30, %32 : vector<4x256xbf16>
    %c3 = arith.constant 3 : index
    %c0_27 = arith.constant 0 : index
    %c0_28 = arith.constant 0 : index
    %34 = vector.load %arg4[%c3, %c0_27, %c0_28] : memref<9x32x4xbf16, #tpu.memory_space<vmem>>, vector<1x32x4xbf16>
    %35 = vector.shape_cast %34 : vector<1x32x4xbf16> to vector<32x4xbf16>
    %cst_29 = arith.constant dense<0.000000e+00> : vector<32x256xf32>
    %36 = tpu.matmul %35, %33, %cst_29 {dimension_numbers = #tpu.dot_dimension_numbers<[1], [0], [0], [1], [0, 0, 1, 1], [], []>} : vector<32x4xbf16>, vector<4x256xbf16>, vector<32x256xf32> -> vector<32x256xf32>
    %37 = arith.addf %28, %36 : vector<32x256xf32>
    %c0_30 = arith.constant 0 : index
    %c0_31 = arith.constant 0 : index
    %c0_32 = arith.constant 0 : index
    %c17 = arith.constant 17 : index
    %38 = vector.load %arg2[%c0_30, %c0_31, %c0_32, %c17] : memref<1x1x4x384xbf16, #tpu.memory_space<vmem>>, vector<1x1x4x256xbf16>
    %39 = vector.shape_cast %38 : vector<1x1x4x256xbf16> to vector<4x256xbf16>
    %c4 = arith.constant 4 : index
    %c0_33 = arith.constant 0 : index
    %c0_34 = arith.constant 0 : index
    %40 = vector.load %arg4[%c4, %c0_33, %c0_34] : memref<9x32x4xbf16, #tpu.memory_space<vmem>>, vector<1x32x4xbf16>
    %41 = vector.shape_cast %40 : vector<1x32x4xbf16> to vector<32x4xbf16>
    %cst_35 = arith.constant dense<0.000000e+00> : vector<32x256xf32>
    %42 = tpu.matmul %41, %39, %cst_35 {dimension_numbers = #tpu.dot_dimension_numbers<[1], [0], [0], [1], [0, 0, 1, 1], [], []>} : vector<32x4xbf16>, vector<4x256xbf16>, vector<32x256xf32> -> vector<32x256xf32>
    %43 = arith.addf %37, %42 : vector<32x256xf32>
    %c0_36 = arith.constant 0 : index
    %c0_37 = arith.constant 0 : index
    %c0_38 = arith.constant 0 : index
    %c18 = arith.constant 18 : index
    %44 = vector.load %arg2[%c0_36, %c0_37, %c0_38, %c18] : memref<1x1x4x384xbf16, #tpu.memory_space<vmem>>, vector<1x1x4x256xbf16>
    %45 = vector.shape_cast %44 : vector<1x1x4x256xbf16> to vector<4x256xbf16>
    %46 = vector.extract_strided_slice %3 {offsets = [1, 0], sizes = [1, 256], strides = [1, 1]} : vector<2x256xbf16> to vector<1x256xbf16>
    %47 = vector.broadcast %46 : vector<1x256xbf16> to vector<4x256xbf16>
    %48 = arith.mulf %45, %47 : vector<4x256xbf16>
    %c5 = arith.constant 5 : index
    %c0_39 = arith.constant 0 : index
    %c0_40 = arith.constant 0 : index
    %49 = vector.load %arg4[%c5, %c0_39, %c0_40] : memref<9x32x4xbf16, #tpu.memory_space<vmem>>, vector<1x32x4xbf16>
    %50 = vector.shape_cast %49 : vector<1x32x4xbf16> to vector<32x4xbf16>
    %cst_41 = arith.constant dense<0.000000e+00> : vector<32x256xf32>
    %51 = tpu.matmul %50, %48, %cst_41 {dimension_numbers = #tpu.dot_dimension_numbers<[1], [0], [0], [1], [0, 0, 1, 1], [], []>} : vector<32x4xbf16>, vector<4x256xbf16>, vector<32x256xf32> -> vector<32x256xf32>
    %52 = arith.addf %43, %51 : vector<32x256xf32>
    %c0_42 = arith.constant 0 : index
    %c0_43 = arith.constant 0 : index
    %c0_44 = arith.constant 0 : index
    %c32 = arith.constant 32 : index
    %53 = vector.load %arg2[%c0_42, %c0_43, %c0_44, %c32] : memref<1x1x4x384xbf16, #tpu.memory_space<vmem>>, vector<1x1x4x256xbf16>
    %54 = vector.shape_cast %53 : vector<1x1x4x256xbf16> to vector<4x256xbf16>
    %55 = vector.extract_strided_slice %3 {offsets = [0, 0], sizes = [1, 256], strides = [1, 1]} : vector<2x256xbf16> to vector<1x256xbf16>
    %56 = vector.broadcast %55 : vector<1x256xbf16> to vector<4x256xbf16>
    %57 = arith.mulf %54, %56 : vector<4x256xbf16>
    %c6 = arith.constant 6 : index
    %c0_45 = arith.constant 0 : index
    %c0_46 = arith.constant 0 : index
    %58 = vector.load %arg4[%c6, %c0_45, %c0_46] : memref<9x32x4xbf16, #tpu.memory_space<vmem>>, vector<1x32x4xbf16>
    %59 = vector.shape_cast %58 : vector<1x32x4xbf16> to vector<32x4xbf16>
    %cst_47 = arith.constant dense<0.000000e+00> : vector<32x256xf32>
    %60 = tpu.matmul %59, %57, %cst_47 {dimension_numbers = #tpu.dot_dimension_numbers<[1], [0], [0], [1], [0, 0, 1, 1], [], []>} : vector<32x4xbf16>, vector<4x256xbf16>, vector<32x256xf32> -> vector<32x256xf32>
    %61 = arith.addf %52, %60 : vector<32x256xf32>
    %c0_48 = arith.constant 0 : index
    %c0_49 = arith.constant 0 : index
    %c0_50 = arith.constant 0 : index
    %c33 = arith.constant 33 : index
    %62 = vector.load %arg2[%c0_48, %c0_49, %c0_50, %c33] : memref<1x1x4x384xbf16, #tpu.memory_space<vmem>>, vector<1x1x4x256xbf16>
    %63 = vector.shape_cast %62 : vector<1x1x4x256xbf16> to vector<4x256xbf16>
    %c7 = arith.constant 7 : index
    %c0_51 = arith.constant 0 : index
    %c0_52 = arith.constant 0 : index
    %64 = vector.load %arg4[%c7, %c0_51, %c0_52] : memref<9x32x4xbf16, #tpu.memory_space<vmem>>, vector<1x32x4xbf16>
    %65 = vector.shape_cast %64 : vector<1x32x4xbf16> to vector<32x4xbf16>
    %cst_53 = arith.constant dense<0.000000e+00> : vector<32x256xf32>
    %66 = tpu.matmul %65, %63, %cst_53 {dimension_numbers = #tpu.dot_dimension_numbers<[1], [0], [0], [1], [0, 0, 1, 1], [], []>} : vector<32x4xbf16>, vector<4x256xbf16>, vector<32x256xf32> -> vector<32x256xf32>
    %67 = arith.addf %61, %66 : vector<32x256xf32>
    %c0_54 = arith.constant 0 : index
    %c0_55 = arith.constant 0 : index
    %c0_56 = arith.constant 0 : index
    %c34 = arith.constant 34 : index
    %68 = vector.load %arg2[%c0_54, %c0_55, %c0_56, %c34] : memref<1x1x4x384xbf16, #tpu.memory_space<vmem>>, vector<1x1x4x256xbf16>
    %69 = vector.shape_cast %68 : vector<1x1x4x256xbf16> to vector<4x256xbf16>
    %70 = vector.extract_strided_slice %3 {offsets = [1, 0], sizes = [1, 256], strides = [1, 1]} : vector<2x256xbf16> to vector<1x256xbf16>
    %71 = vector.broadcast %70 : vector<1x256xbf16> to vector<4x256xbf16>
    %72 = arith.mulf %69, %71 : vector<4x256xbf16>
    %c8 = arith.constant 8 : index
    %c0_57 = arith.constant 0 : index
    %c0_58 = arith.constant 0 : index
    %73 = vector.load %arg4[%c8, %c0_57, %c0_58] : memref<9x32x4xbf16, #tpu.memory_space<vmem>>, vector<1x32x4xbf16>
    %74 = vector.shape_cast %73 : vector<1x32x4xbf16> to vector<32x4xbf16>
    %cst_59 = arith.constant dense<0.000000e+00> : vector<32x256xf32>
    %75 = tpu.matmul %74, %72, %cst_59 {dimension_numbers = #tpu.dot_dimension_numbers<[1], [0], [0], [1], [0, 0, 1, 1], [], []>} : vector<32x4xbf16>, vector<4x256xbf16>, vector<32x256xf32> -> vector<32x256xf32>
    %76 = arith.addf %67, %75 : vector<32x256xf32>
    %c0_60 = arith.constant 0 : index
    %c0_61 = arith.constant 0 : index
    %77 = vector.load %arg5[%c0_60, %c0_61] : memref<32x1xf32, #tpu.memory_space<vmem>>, vector<32x1xf32>
    %78 = vector.broadcast %77 : vector<32x1xf32> to vector<32x256xf32>
    %79 = arith.addf %76, %78 : vector<32x256xf32>
    %cst_62 = arith.constant 0.000000e+00 : f32
    %80 = vector.broadcast %cst_62 : f32 to vector<32x256xf32>
    %81 = arith.maximumf %79, %80 : vector<32x256xf32>
    %c0_63 = arith.constant 0 : index
    %c0_64 = arith.constant 0 : index
    %82 = vector.load %arg9[%c0_63, %c0_64] : memref<32x1xf32, #tpu.memory_space<vmem>>, vector<32x1xf32>
    %cst_65 = arith.constant dense<0.000000e+00> : vector<32xf32>
    %83 = vector.multi_reduction <add>, %81, %cst_65 [1] : vector<32x256xf32> to vector<32xf32>
    %84 = vector.shape_cast %83 : vector<32xf32> to vector<32x1xf32>
    %85 = arith.addf %82, %84 : vector<32x1xf32>
    %c0_66 = arith.constant 0 : index
    %c0_67 = arith.constant 0 : index
    %86 = vector.load %arg9[%c0_66, %c0_67] : memref<32x1xf32, #tpu.memory_space<vmem>>, vector<32x1xf32>
    tpu.vector_store %arg9[%c0_66, %c0_67], %85 {strides = array<i32>} : memref<32x1xf32, #tpu.memory_space<vmem>>, vector<32x1xf32>,
    %c7_i32 = arith.constant 7 : i32
    %87 = arith.cmpi eq, %arg1, %c7_i32 : i32
    %88 = arith.extui %87 : i1 to i32
    %c0_i32_68 = arith.constant 0 : i32
    %89 = arith.cmpi ne, %88, %c0_i32_68 : i32
    scf.if %89 {
      %c0_69 = arith.constant 0 : index
      %c0_70 = arith.constant 0 : index
      %90 = vector.load %arg9[%c0_69, %c0_70] : memref<32x1xf32, #tpu.memory_space<vmem>>, vector<32x1xf32>
      %cst_71 = arith.constant 4.8828125E-4 : f32
      %91 = vector.broadcast %cst_71 : f32 to vector<32x1xf32>
      %92 = arith.mulf %90, %91 : vector<32x1xf32>
      %c0_72 = arith.constant 0 : index
      %c0_73 = arith.constant 0 : index
      %93 = vector.load %arg6[%c0_72, %c0_73] : memref<32x128xf32, #tpu.memory_space<vmem>>, vector<32x128xf32>
      %94 = vector.broadcast %92 : vector<32x1xf32> to vector<32x128xf32>
      %95 = arith.mulf %94, %93 : vector<32x128xf32>
      %cst_74 = arith.constant dense<0.000000e+00> : vector<128xf32>
      %96 = vector.multi_reduction <add>, %95, %cst_74 [0] : vector<32x128xf32> to vector<128xf32>
      %97 = vector.shape_cast %96 : vector<128xf32> to vector<1x128xf32>
      %c0_75 = arith.constant 0 : index
      %c0_76 = arith.constant 0 : index
      %98 = vector.load %arg7[%c0_75, %c0_76] : memref<1x128xf32, #tpu.memory_space<vmem>>, vector<1x128xf32>
      %99 = arith.addf %97, %98 : vector<1x128xf32>
      %c0_77 = arith.constant 0 : index
      %c0_78 = arith.constant 0 : index
      %c0_79 = arith.constant 0 : index
      %100 = vector.load %arg8[%c0_77, %c0_78, %c0_79] : memref<1x1x128xf32, #tpu.memory_space<vmem>>, vector<1x1x128xf32>
      %101 = vector.shape_cast %100 : vector<1x1x128xf32> to vector<1x128xf32>
      %102 = vector.shape_cast %99 : vector<1x128xf32> to vector<1x1x128xf32>
      tpu.vector_store %arg8[%c0_77, %c0_78, %c0_79], %102 {strides = array<i32>} : memref<1x1x128xf32, #tpu.memory_space<vmem>>, vector<1x1x128xf32>,
    } else {
    }
    return
  }
  func.func @transform_0(%arg0: i32, %arg1: i32) -> (i32, i32, i32, i32) {
    %c0_i32 = arith.constant 0 : i32
    %c0_i32_0 = arith.constant 0 : i32
    %c0_i32_1 = arith.constant 0 : i32
    return %arg0, %arg1, %c0_i32, %c0_i32_0 : i32, i32, i32, i32
  }
  func.func @transform_1(%arg0: i32, %arg1: i32) -> (i32, i32) {
    %c0_i32 = arith.constant 0 : i32
    %c0_i32_0 = arith.constant 0 : i32
    %c0_i32_1 = arith.constant 0 : i32
    return %c0_i32, %c0_i32_0 : i32, i32
  }
  func.func @transform_2(%arg0: i32, %arg1: i32) -> (i32, i32, i32) {
    %c0_i32 = arith.constant 0 : i32
    %c0_i32_0 = arith.constant 0 : i32
    %c0_i32_1 = arith.constant 0 : i32
    %c0_i32_2 = arith.constant 0 : i32
    return %c0_i32, %c0_i32_0, %c0_i32_1 : i32, i32, i32
  }
  func.func @transform_3(%arg0: i32, %arg1: i32) -> (i32, i32) {
    %c0_i32 = arith.constant 0 : i32
    %c0_i32_0 = arith.constant 0 : i32
    %c0_i32_1 = arith.constant 0 : i32
    return %c0_i32, %c0_i32_0 : i32, i32
  }
  func.func @transform_4(%arg0: i32, %arg1: i32) -> (i32, i32) {
    %c0_i32 = arith.constant 0 : i32
    %c0_i32_0 = arith.constant 0 : i32
    %c0_i32_1 = arith.constant 0 : i32
    return %c0_i32, %c0_i32_0 : i32, i32
  }
  func.func @transform_5(%arg0: i32, %arg1: i32) -> (i32, i32) {
    %c0_i32 = arith.constant 0 : i32
    %c0_i32_0 = arith.constant 0 : i32
    %c0_i32_1 = arith.constant 0 : i32
    return %c0_i32, %c0_i32_0 : i32, i32
  }
  func.func @transform_6(%arg0: i32, %arg1: i32) -> (i32, i32, i32) {
    %c0_i32 = arith.constant 0 : i32
    %c0_i32_0 = arith.constant 0 : i32
    %c0_i32_1 = arith.constant 0 : i32
    return %arg0, %c0_i32, %c0_i32_0 : i32, i32, i32
  }
}

</mosaic_0001>

<bundles_post_ra>
// kernel: wrapped_recognizer_forward.1
= control target key start
LH: loop header
LB: loop body
LE: loop exit
PB: predicated region body
PF: predicated region fallthrough
CT: control target
= control target key end

     0   :  { %11 = vsyncpa [#allocation4], 0  ;;  %s2350_s0 = inlined_call_operand.vmem [shape: bf16[2,8,4,384], index: 0, kind: input, shape index: {}]   ;;  %s2351_s1 = inlined_call_operand.vmem [shape: bf16[2,256], index: 1, kind: input, shape index: {}]   ;;  %s2352_s2 = inlined_call_operand.vmem [shape: bf16[9,32,4], index: 2, kind: input, shape index: {}]   ;;  %s2353_s3 = inlined_call_operand.vmem [shape: f32[32,1], index: 3, kind: input, shape index: {}]   ;;  %s2354_s4 = inlined_call_operand.vmem [shape: f32[32,128], index: 4, kind: input, shape index: {}]   ;;  %s2355_s5 = inlined_call_operand.vmem [shape: f32[1,128], index: 5, kind: input, shape index: {}]   ;;  %s2356_s6 = inlined_call_operand.hbm [shape: f32[2,1,128], index: 6, kind: output, shape index: {}]  }
   0x1   :  { %13 = vsyncpa [#allocation4 + $0x1], 0  ;;  %s2023_s21 = smov 0   ;;  %s2025_s22 = smov 0  }
   0x2   :  { %s2027_s23 = smov 0   ;;  %s2029_s24 = smov 0  }
   0x3   :  { %s2031_s25 = smov 0   ;;  %s2033_s26 = smov 0  }
   0x4   :  { %s2035_s27 = smov 0   ;;  %s2037_s28 = smov 0  }
   0x5 LB: > { %s1602_s29 = sadd.s32 4294967295, %s1967_s28   ;;  %s1603_s30 = sadd.s32 4294967294, %s1967_s28   ;;  %s1967_s28 = sphi %s2037_s28, %s19_s28   ;;  %s1963_s27 = sphi %s2035_s27, %s2365_s27   ;;  %s1959_s26 = sphi %s2033_s26, %s2364_s26   ;;  %s1955_s25 = sphi %s2031_s25, %s2363_s25   ;;  %s1951_s24 = sphi %s2029_s24, %s2362_s24   ;;  %s1947_s23 = sphi %s2027_s23, %s2361_s23   ;;  %s1943_s22 = sphi %s2025_s22, %s2360_s22   ;;  %s1939_s21 = sphi %s2023_s21, %s2359_s21  }
   0x6   : > { %s28_s7 = sadd.s32 1, %s1959_s26  ;;  %s31_s8 = sadd.s32 1, %s1963_s27 }
   0x7   : > { %p29_p0 = scmp.ge.s32.totalorder %s28_s7, 8  ;;  %p181_p1 = scmp.ne.s32.totalorder %s1947_s23, %s1943_s22 }
   0x8   : > { %p182_p2 = scmp.eq.s32.totalorder %s1602_s29, 15  ;;  %p187_p4 = scmp.ne.s32.totalorder %s1943_s22, %s1939_s21 }
   0x9   : > { %s2367_s7 = smov (%p29_p0, %s28_s7), 0  ;;  %s2369_s8 = smov (!%p29_p0, %s31_s8), %s1963_s27 }
   0xa   : > { %p2072_p3 = por %p182_p2, %p181_p1  ;;  %p33_p5 = scmp.ge.s32.totalorder %s2369_s8, 2 }
   0xb   : > { %p188_p6 = scmp.eq.s32.totalorder %s1603_s30, 15  ;;  %p1606_p7 = scmp.ge.s32.totalorder %s1967_s28, 1 }
   0xc   : > { %p233_p8 = scmp.lt.s32.totalorder %s1967_s28, 17  ;;  %s2371_s8 = smov (%p33_p5, %s2369_s8), 0 }
   0xd   : > { %p2082_p9 = por %p188_p6, %p187_p4  ;;  %s168_s11 = ssub.s32 %s1963_s27, %s2371_s8 }
   0xe   : > { %p234_p10 = pnand %p1606_p7, %p233_p8  ;;  %s171_s12 = sadd.s32 1, %s1947_s23 }
   0xf   : > { %p169_p11 = scmp.eq.s32.totalorder %s168_s11, 0  ;;  %s264_s14 = sand.u32 (!%p234_p10), 1, %s1943_s22  }
  0x10   : > { %237 = sbr.rel (%p234_p10) target bundleno = 905 (0x389), region = 44  ;;  %p266_p12 = scmp.lt.s32.totalorder (!%p234_p10), %s1955_s25, 1 }
  0x11   : > { %s2090_s13 = scalar_select %p169_p11, %s1947_s23, %s171_s12  }
  0x12   : > { %p268_p13 = scmp.lt.s32.totalorder (!%p234_p10), %s1951_s24, 7  ;;  %s2104_s12 = scalar_lea.vmem (!%p234_p10), [#allocation3], %s264_s14 }
  0x13   : > { %p1608_p0 = scmp.ne.s32.totalorder (!%p234_p10), %s1951_s24, 0 }
  0x17   : > { %s267_s15 = scalar_select %p266_p12, %s1955_s25, 1 }
  0x18   : > { %s269_s16 = scalar_select %p268_p13, %s1951_s24, 7 }
  0x19   : > { %s1758_s17 = smul.u32 24, %s267_s15  ;;  %vm280_vm0 = vcmask (!%p1608_p0), 7168   ;;  %v1969_v0 = vmov (!%p1608_p0), 0.0  }
  0x1a   : > { %s1757_s18 = smul.u32 3, %s269_s16  ;;  %281 = vst.msk [vmem:[#allocation2] sm:$0xff] (!%p1608_p0), %vm280_vm0, %v1969_v0  ;;  %282 = vst.msk [vmem:[#allocation2 + $0x8] sm:$0xff] (!%p1608_p0), %vm280_vm0, %v1969_v0 }
  0x1b   : > { %279 = sbr.rel (%p1608_p0) target bundleno = 34 (0x22), region = 48  ;;  %283 = vst.msk [vmem:[#allocation2 + $0x10] sm:$0xff] (!%p1608_p0), %vm280_vm0, %v1969_v0  ;;  %284 = vst.msk [vmem:[#allocation2 + $0x18] sm:$0xff] (!%p1608_p0), %vm280_vm0, %v1969_v0 }
  0x1c   : > { %s272_s19 = sadd.s32 %s1758_s17, %s1757_s18 }
  0x1d   : > { %s1607_s20 = sshll.u32 %s272_s19, 1 }
  0x1e   : > { %s2100_s11 = scalar_lea.vmem %s2350_s0, %s1607_s20 }
  0x22 PF: > { %v1609_v1 = vld.sshfl [vmem:[%s2351_s1] sm:$0x11 pattern:$0x75316420]  ;;  %v299_v2 = vlaneseq  ;;  %v1970_v3 = vmov 1966171168  }
  0x23   : > { %v297_v4 = vunpack.c.l.s4 %v1970_v3  ;;  %v295_v6 = vcombine.high %v1609_v1, %v1609_v1  ;;  %v1971_v9 = vmov 1983009808   ;;  %v340_v28 = vld [vmem:[%s2100_s11] sm:$0x3f]  ;;  %s1972_s17 = smov 18   ;;  %s1973_s18 = smov 2  }
  0x24   : > { %v300_v5 = vshrl.u32 %v299_v2, 7  ;;  %v328_v10 = vunpack.c.l.s4 %v1971_v9  ;;  %s1974_s19 = smov 32   ;;  %s1975_s20 = smov 16   ;;  %v357_v33 = vcombine.high %v340_v28, %v340_v28  ;;  %v801_v34 = vld [vmem:[%s2100_s11] sm:$0x3f]  ;;  %v1979_v40 = vmov 0  }
  0x25   : > { %v298_v7 = vunpack.c.0.s8 %v297_v4  ;;  %s1976_s29 = smov 127   ;;  %s1977_s30 = smov 34   ;;  %v818_v38 = vcombine.high %v801_v34, %v801_v34  ;;  %428 = vmatprep.mubr.bf16.mxu1 %v1979_v40  ;;  %887 = vmatprep.mubr.bf16.mxu0 %v1979_v40  ;;  %vm920_vm1 = vcmask 146432   ;;  %v286_v43 = vld [vmem:[%s2100_s11] sm:$0xf]  ;;  %vm1042_vm2 = vcmask 261120  }
  0x26   : > { %v315_v8 = vsub.s32 0, %v300_v5  ;;  %v329_v14 = vunpack.c.0.s8 %v328_v10  ;;  %s1978_s15 = smov 111   ;;  %1848 = vset.pattern.permute.xlu1 %v1979_v40  ;;  %1849 = vset.pattern.permute.xlu0 %v1979_v40  ;;  %v916_v44 = vld [vmem:[%s2100_s11] sm:$0x3f]  ;;  %vm561_vm3 = vcmask 15360   ;;  %vm379_vm4 = vcmask 1039360  }
  0x27   : > { %v301_v11 = vsub.s32 %v298_v7, %v300_v5  ;;  %v1038_v51 = vld [vmem:[%s2100_s11] sm:$0x3f]  ;;  %s1980_s16 = smov 110   ;;  %vm389_vm5 = vcmask 1041408   ;;  %vm840_vm6 = vcmask 908288   ;;  %vm382_vm7 = vcmask 31744  }
  0x28   : > { %v2110_v23 = vsub.s32 %v329_v14, %v300_v5  ;;  %v533_v62 = vld [vmem:[%s2100_s11] sm:$0x3f]  ;;  %vm683_vm8 = vcmask 130048   ;;  %vm1279_vm9 = vcmask 277504   ;;  %vm962_vm10 = vcmask 900096   ;;  %p1687_p1 = scmp.ne.s32.totalorder %s1951_s24, 7 }
  0x29   : > { %v302_v12 = vrot.slane %v1609_v1, %v301_v11  ;;  %v309_v13 = vrot.slane %v295_v6, %v301_v11  ;;  %vm1084_vm11 = vcmask 785408   ;;  %vm603_vm12 = vcmask 1031168  }
  0x2a   : > { %v364_v31 = vrot.slane %v340_v28, %v2110_v23  ;;  %v371_v35 = vrot.slane %v357_v33, %v2110_v23  ;;  %v825_v36 = vrot.slane %v801_v34, %v2110_v23  ;;  %v832_v39 = vrot.slane %v818_v38, %v2110_v23  ;;  %v1855_v33 = vld [vmem:[%s2352_s2 + $0x40] sm:$0xff]  }
  0x2b   : > { %v534_v15 = vshrl.u32 %v302_v12, 16  ;;  %v541_v16 = vshrl.u32 %v309_v13, 16  ;;  %v311_v17 = vpack.i.b16 %v302_v12, %v302_v12  ;;  %v318_v18 = vpack.i.b16 %v309_v13, %v309_v13  ;;  %v1853_v12 = vld [vmem:[%s2352_s2 + $0x10] sm:$0xff]  }
  0x2c   : > { %v372_v32 = vcombine.high %v364_v31, %v364_v31  ;;  %v833_v37 = vcombine.high %v825_v36, %v825_v36  ;;  %vm1199_vm13 = vcmask 777216   ;;  %vm725_vm14 = vcmask 916480  }
  0x2d   : > { %v535_v19 = vpack.i.b16 %v534_v15, %v534_v15  ;;  %v542_v20 = vpack.i.b16 %v541_v16, %v541_v16  ;;  %v316_v21 = vrot.slane %v311_v17, %v315_v8  ;;  %v323_v22 = vrot.slane %v318_v18, %v315_v8 }
  0x2e   : > { %vm1321_vm15 = vcmask 769024   ;;  %vm1457_vm0 = vcmask 7168  }
  0x2f   : > { %v540_v24 = vrot.slane %v535_v19, %v315_v8  ;;  %v547_v25 = vrot.slane %v542_v20, %v315_v8  ;;  %v326_v27 = vcombine.low %v316_v21, %v323_v22  ;;  %v1160_v19 = vld [vmem:[%s2100_s11] sm:$0x3f] }
  0x31   : > { %v550_v26 = vcombine.low %v540_v24, %v547_v25  ;;  %v333_v30 = vrot.slane %v326_v27, %v2110_v23  ;;  %v1184_v24 = vrot.slane %v1160_v19, %v2110_v23  ;;  %v679_v27 = vld [vmem:[%s2100_s11] sm:$0x3f] }
  0x33   : > { %v557_v29 = vrot.slane %v550_v26, %v2110_v23  ;;  %v335_v47 = vmul.bf16 %v333_v30, %v286_v43 }
  0x35   : > { %917 = vrot.lane.b32.xlu0 %v557_v29, %s1972_s17  ;;  %558 = vrot.lane.b32.xlu1 %v557_v29, %s1973_s18  ;;  %v466_v61 = vrot.slane %v335_v47, %v2110_v23  ;;  %s1981_s17 = smov 96  }
  0x37   : > { %v467_v9 = vcombine.high %v466_v61, %v466_v61  ;;  %v475_v17 = vsel %vm389_vm5, %v466_v61, 0  ;;  %v1857_v61 = vld [vmem:[%s2352_s2 + $0x50] sm:$0xff]  }
  0x39   : > { %1039 = vrot.lane.b32.xlu0 %v333_v30, %s1974_s19  ;;  %680 = vrot.lane.b32.xlu1 %v333_v30, %s1975_s20  ;;  %s1982_s20 = smov 126   ;;  %v1177_v30 = vcombine.high %v1160_v19, %v1160_v19 }
  0x3d   : > { %375 = vrot.lane.b32.xlu0 %v372_v32, %s1976_s29  ;;  %373 = vrot.lane.b32.xlu1 %v364_v31, %s1976_s29  ;;  %v1854_v31 = vld [vmem:[%s2352_s2 + $0x18] sm:$0xff]  }
  0x41   : > { %1276 = vrot.lane.b32.xlu0 %v557_v29, %s1977_s30  ;;  %377 = vrot.lane.b32.xlu1 %v371_v35, %s1976_s29  ;;  %v1192_v35 = vcombine.high %v1184_v24, %v1184_v24 }
  0x45   : > { %834 = vrot.lane.b32.xlu0 %v825_v36, %s1978_s15  ;;  %836 = vrot.lane.b32.xlu1 %v833_v37, %s1978_s15  ;;  %v1191_v36 = vrot.slane %v1177_v30, %v2110_v23  ;;  %v1275_v37 = vld [vmem:[%s2100_s11] sm:$0x3f]  ;;  %s1985_s11 = smov 94  }
  0x49   : > { %838 = vrot.lane.b32.xlu0 %v832_v39, %s1978_s15 }
  0xa7   : > { %v918_v41 = vpop.permute.xlu0 %917  ;;  %v559_v42 = vpop.permute.xlu1 %558 }
  0xa8   : > { %v919_v45 = vrot.slane %v918_v41, 6  ;;  %v560_v53 = vrot.slane %v559_v42, 6 }
  0xaa   : > { %v921_v46 = vsel %vm920_vm1, %v919_v45, %v918_v41  ;;  %v562_v63 = vsel %vm561_vm3, %v560_v53, %v559_v42  ;;  %v1400_v53 = vld [vmem:[%s2353_s3 + $0x18] sm:$0xff] }
  0xab   : > { %v923_v48 = vmul.bf16 %v921_v46, %v916_v44  ;;  %v1040_v49 = vpop.permute.xlu0 %1039  ;;  %v2126_v50 = vpop.permute.xlu1 %680  ;;  %v564_v4 = vmul.bf16 %v562_v63, %v533_v62  ;;  %v1856_v44 = vld [vmem:[%s2352_s2] sm:$0xff]  }
  0xac   : > { %v1041_v52 = vrot.slane %v1040_v49, 6  ;;  %v682_v18 = vrot.slane %v2126_v50, 6 }
  0xad   : > { %v940_v54 = vcombine.high %v923_v48, %v923_v48  ;;  %v947_v55 = vrot.slane %v923_v48, %v2110_v23  ;;  %v581_v13 = vcombine.high %v564_v4, %v564_v4  ;;  %v588_v14 = vrot.slane %v564_v4, %v2110_v23 }
  0xae   : > { %v1043_v56 = vsel %vm1042_vm2, %v1041_v52, %v1040_v49  ;;  %v684_v28 = vsel %vm683_vm8, %v682_v18, %v2126_v50  ;;  %v1858_v50 = vld [vmem:[%s2352_s2 + $0x8] sm:$0xff]  }
  0xaf   : > { %v1045_v57 = vmul.bf16 %v1043_v56, %v1038_v51  ;;  %956 = vrot.lane.b32.xlu1 %v947_v55, %s1980_s16  ;;  %v955_v58 = vcombine.high %v947_v55, %v947_v55  ;;  %v376_v59 = vpop.permute.xlu0 %375  ;;  %v374_v60 = vpop.permute.xlu1 %373  ;;  %v954_v2 = vrot.slane %v940_v54, %v2110_v23  ;;  %v596_v21 = vcombine.high %v588_v14, %v588_v14  ;;  %v1397_v51 = vld [vmem:[%s2353_s3] sm:$0xff]  ;;  %v1398_v52 = vld [vmem:[%s2353_s3 + $0x8] sm:$0xff] }
  0xb0   : > { %v380_v0 = vsel %vm379_vm4, %v374_v60, %v376_v59  ;;  %v595_v22 = vrot.slane %v581_v13, %v2110_v23  ;;  %v686_v34 = vmul.bf16 %v684_v28, %v679_v27  ;;  %v1863_v27 = vld [vmem:[%s2352_s2 + $0x68] sm:$0xff]  }
  0xb1   : > { %v1062_v1 = vcombine.high %v1045_v57, %v1045_v57  ;;  %958 = vrot.lane.b32.xlu0 %v955_v58, %s1980_s16  ;;  %v1069_v3 = vrot.slane %v1045_v57, %v2110_v23  ;;  %v391_v8 = vsel %vm389_vm5, %v380_v0, 0 }
  0xb2   : > { %v703_v39 = vcombine.high %v686_v34, %v686_v34  ;;  %v710_v41 = vrot.slane %v686_v34, %v2110_v23 }
  0xb3   : > { %960 = vrot.lane.b32.xlu1 %v954_v2, %s1980_s16  ;;  %v1077_v5 = vcombine.high %v1069_v3, %v1069_v3  ;;  %v1277_v6 = vpop.permute.xlu0 %1276  ;;  %v378_v7 = vpop.permute.xlu1 %377  ;;  %v1076_v11 = vrot.slane %v1062_v1, %v2110_v23 }
  0xb4   : > { %v381_v10 = vsel %vm379_vm4, %v376_v59, %v378_v7  ;;  %v1278_v32 = vrot.slane %v1277_v6, 6  ;;  %v718_v42 = vcombine.high %v710_v41, %v710_v41  ;;  %v717_v45 = vrot.slane %v703_v39, %v2110_v23  ;;  %v1870_v39 = vld [vmem:[%s2352_s2 + $0x88] sm:$0xff]  }
  0xb5   : > { %1078 = vrot.lane.b32.xlu0 %v1069_v3, %s1981_s17  ;;  %1616 = vmatprep.subr.msk.bf16.mxu1 %vm389_vm5, %v381_v10 }
  0xb6   : > { %397 = vmatpush1.bf16.msra.mxu1 %v391_v8  ;;  %v1280_v38 = vsel %vm1279_vm9, %v1278_v32, %v1277_v6 }
  0xb7   : > { %1080 = vrot.lane.b32.xlu1 %v1077_v5, %s1981_s17  ;;  %v835_v15 = vpop.permute.xlu0 %834  ;;  %v837_v16 = vpop.permute.xlu1 %836  ;;  %1621 = vmatprep.subr.msk.bf16.mxu1 %vm389_vm5, %v467_v9  ;;  %v1282_v43 = vmul.bf16 %v1280_v38, %v1275_v37  ;;  %v1859_v5 = vld [vmem:[%s2352_s2 + $0x58] sm:$0xff]   ;;  %v1869_v38 = vld [vmem:[%s2352_s2 + $0x80] sm:$0xff]  }
  0xb8   : > { %v841_v20 = vsel %vm840_vm6, %v835_v15, %v837_v16  ;;  %v1861_v15 = vld [vmem:[%s2352_s2 + $0x60] sm:$0xff]   ;;  %v1867_v37 = vld [vmem:[%s2352_s2 + $0x78] sm:$0xff]  }
  0xb9   : > { %1082 = vrot.lane.b32.xlu0 %v1076_v11, %s1981_s17  ;;  %1617 = vmatmul.mubr.msk.bf16.vlgmr.msra.gmra.mrb[0].mxu1 %vm382_vm7, %v1853_v12  ;;  %v2153_v26 = vsel %vm389_vm5, %v841_v20, 0  ;;  %s1983_s17 = smov 95   ;;  %v1299_v46 = vcombine.high %v1282_v43, %v1282_v43  ;;  %v1306_v47 = vrot.slane %v1282_v43, %v2110_v23  ;;  %v1860_v11 = vld [vmem:[%s2352_s2 + $0x20] sm:$0xff]   ;;  %v1862_v20 = vld [vmem:[%s2352_s2 + $0x28] sm:$0xff]  }
  0xba   : > { %438 = vmatprep.mubr.bf16.mxu1 %v1979_v40  ;;  %481 = vmatpush1.bf16.msra.mxu1 %v475_v17 }
  0xbb   : > { %597 = vrot.lane.b32.xlu1 %v588_v14, %s1982_s20  ;;  %v839_v25 = vpop.permute.xlu0 %838  ;;  %v1314_v48 = vcombine.high %v1306_v47, %v1306_v47  ;;  %v1313_v49 = vrot.slane %v1299_v46, %v2110_v23  ;;  %v1399_v23 = vld [vmem:[%s2353_s3 + $0x10] sm:$0xff] }
  0xbc   : > { %v2158_v29 = vsel %vm840_vm6, %v837_v16, %v839_v25 }
  0xbd   : > { %599 = vrot.lane.b32.xlu0 %v596_v21, %s1982_s20  ;;  %1648 = vmatprep.subr.msk.bf16.mxu0 %vm389_vm5, %v2158_v29 }
  0xbe   : > { %856 = vmatpush1.bf16.msra.mxu0 %v2153_v26 }
  0xbf   : > { %601 = vrot.lane.b32.xlu1 %v595_v22, %s1982_s20  ;;  %s1984_s20 = smov 112  }
  0xc1   : > { %1193 = vrot.lane.b32.xlu0 %v1184_v24, %s1983_s17  ;;  %1618 = vmatmul.mubr.msk.bf16.gmra.mrb[4].mxu1 %vm382_vm7, %v1854_v31  ;;  %v1864_v31 = vld [vmem:[%s2352_s2 + $0x30] sm:$0xff]  }
  0xc2   : > { %1649 = vmatmul.mubr.msk.bf16.vlgmr.msra.gmra.mrb[0].mxu0 %vm382_vm7, %v1855_v33  ;;  %512 = vmatprep.mubr.bf16.mxu1 %v1979_v40 }
  0xc3   : > { %1195 = vrot.lane.b32.xlu1 %v1192_v35, %s1983_s17  ;;  %1009 = vmatprep.mubr.bf16.mxu0 %v1979_v40 }
  0xc5   : > { %1197 = vrot.lane.b32.xlu0 %v1191_v36, %s1983_s17  ;;  %v1866_v36 = vld [vmem:[%s2352_s2 + $0x38] sm:$0xff]  }
  0xc7   : > { %719 = vrot.lane.b32.xlu1 %v710_v41, %s1984_s20 }
  0xc9   : > { %721 = vrot.lane.b32.xlu0 %v718_v42, %s1984_s20  ;;  %1622 = vmatmul.mubr.msk.bf16.vlgmr.msra.gmra.mrb[0].mxu1 %vm382_vm7, %v1856_v44 }
  0xca   : > { %522 = vmatprep.mubr.bf16.mxu1 %v1979_v40 }
  0xcb   : > { %723 = vrot.lane.b32.xlu1 %v717_v45, %s1984_s20 }
  0xcd   : > { %1315 = vrot.lane.b32.xlu0 %v1306_v47, %s1985_s11 }
  0xcf   : > { %1317 = vrot.lane.b32.xlu1 %v1314_v48, %s1985_s11 }
  0xd1   : > { %1319 = vrot.lane.b32.xlu0 %v1313_v49, %s1985_s11  ;;  %1623 = vmatmul.mubr.msk.bf16.gmra.mrb[4].mxu1 %vm382_vm7, %v1858_v50 }
  0xd2   : > { %650 = vmatprep.mubr.bf16.mxu1 %v1979_v40 }
  0xd3   : > { %1403 = vperm.xlu1 %1848, %v1397_v51  }
  0xd5   : > { %1408 = vperm.xlu0 %1849, %v1398_v52  }
  0xd7   : > { %1413 = vperm.xlu1 %1848, %v1399_v23  }
  0xdb   : > { %1418 = vperm.xlu1 %1848, %v1400_v53  }
 0x121   : > { %v957_v54 = vpop.permute.xlu1 %956 }
 0x123   : > { %v959_v55 = vpop.permute.xlu0 %958 }
 0x124   : > { %v963_v56 = vsel %vm962_vm10, %v957_v54, %v959_v55 }
 0x125   : > { %v961_v57 = vpop.permute.xlu1 %960  ;;  %v972_v59 = vsel %vm389_vm5, %v963_v56, 0 }
 0x126   : > { %v964_v58 = vsel %vm962_vm10, %v959_v55, %v961_v57 }
 0x127   : > { %1657 = vmatprep.subr.msk.bf16.mxu0 %vm389_vm5, %v964_v58  ;;  %v1079_v60 = vpop.permute.xlu0 %1078 }
 0x128   : > { %978 = vmatpush1.bf16.msra.mxu0 %v972_v59 }
 0x129   : > { %v1081_v62 = vpop.permute.xlu1 %1080 }
 0x12a   : > { %v1085_v63 = vsel %vm1084_vm11, %v1079_v60, %v1081_v62 }
 0x12b   : > { %v1094_v0 = vsel %vm389_vm5, %v1085_v63, 0  ;;  %1658 = vmatmul.mubr.msk.bf16.vlgmr.msra.gmra.mrb[0].mxu0 %vm382_vm7, %v1857_v61  ;;  %v1083_v1 = vpop.permute.xlu0 %1082 }
 0x12c   : > { %v1086_v2 = vsel %vm1084_vm11, %v1081_v62, %v1083_v1  ;;  %1019 = vmatprep.mubr.bf16.mxu0 %v1979_v40 }
 0x12d   : > { %v598_v3 = vpop.permute.xlu1 %597  ;;  %1666 = vmatprep.subr.msk.bf16.mxu0 %vm389_vm5, %v1086_v2 }
 0x12e   : > { %1100 = vmatpush1.bf16.msra.mxu0 %v1094_v0 }
 0x12f   : > { %v600_v4 = vpop.permute.xlu0 %599 }
 0x130   : > { %v604_v6 = vsel %vm603_vm12, %v598_v3, %v600_v4 }
 0x131   : > { %v613_v7 = vsel %vm389_vm5, %v604_v6, 0  ;;  %v602_v8 = vpop.permute.xlu1 %601 }
 0x132   : > { %v605_v9 = vsel %vm603_vm12, %v600_v4, %v602_v8 }
 0x133   : > { %1630 = vmatprep.subr.msk.bf16.mxu1 %vm389_vm5, %v605_v9  ;;  %1659 = vmatmul.mubr.msk.bf16.gmra.mrb[4].mxu0 %vm382_vm7, %v1859_v5  ;;  %v1194_v10 = vpop.permute.xlu0 %1193 }
 0x134   : > { %619 = vmatpush1.bf16.msra.mxu1 %v613_v7  ;;  %1131 = vmatprep.mubr.bf16.mxu0 %v1979_v40 }
 0x135   : > { %v1196_v12 = vpop.permute.xlu1 %1195 }
 0x136   : > { %v1200_v13 = vsel %vm1199_vm13, %v1194_v10, %v1196_v12 }
 0x137   : > { %1631 = vmatmul.mubr.msk.bf16.vlgmr.msra.gmra.mrb[0].mxu1 %vm382_vm7, %v1860_v11  ;;  %v1198_v14 = vpop.permute.xlu0 %1197  ;;  %v1209_v17 = vsel %vm389_vm5, %v1200_v13, 0 }
 0x138   : > { %v1201_v16 = vsel %vm1199_vm13, %v1196_v12, %v1198_v14  ;;  %660 = vmatprep.mubr.bf16.mxu1 %v1979_v40 }
 0x139   : > { %v720_v18 = vpop.permute.xlu1 %719  ;;  %1675 = vmatprep.subr.msk.bf16.mxu0 %vm389_vm5, %v1201_v16 }
 0x13b   : > { %1667 = vmatmul.mubr.msk.bf16.vlgmr.msra.gmra.mrb[0].mxu0 %vm382_vm7, %v1861_v15  ;;  %v722_v19 = vpop.permute.xlu0 %721 }
 0x13c   : > { %v726_v21 = vsel %vm725_vm14, %v720_v18, %v722_v19  ;;  %1215 = vmatpush1.bf16.msra.mxu0 %v1209_v17  ;;  %1141 = vmatprep.mubr.bf16.mxu0 %v1979_v40 }
 0x13d   : > { %v724_v22 = vpop.permute.xlu1 %723  ;;  %v735_v24 = vsel %vm389_vm5, %v726_v21, 0 }
 0x13e   : > { %v727_v25 = vsel %vm725_vm14, %v722_v19, %v724_v22 }
 0x13f   : > { %1632 = vmatmul.mubr.msk.bf16.gmra.mrb[4].mxu1 %vm382_vm7, %v1862_v20  ;;  %1639 = vmatprep.subr.msk.bf16.mxu1 %vm389_vm5, %v727_v25  ;;  %v1316_v28 = vpop.permute.xlu0 %1315 }
 0x140   : > { %741 = vmatpush1.bf16.msra.mxu1 %v735_v24  ;;  %772 = vmatprep.mubr.bf16.mxu1 %v1979_v40  ;;  %v1437_v24 = vld [vmem:[#allocation2] sm:$0xff] }
 0x141   : > { %1691 = vmatprep.subr.msk.bf16.mxu1 %vm389_vm5, %v2158_v29  ;;  %v1318_v30 = vpop.permute.xlu1 %1317  ;;  %v1865_v29 = vld [vmem:[%s2352_s2 + $0x70] sm:$0xff]  }
 0x142   : > { %v1322_v34 = vsel %vm1321_vm15, %v1316_v28, %v1318_v30 }
 0x143   : > { %1668 = vmatmul.mubr.msk.bf16.gmra.mrb[4].mxu0 %vm382_vm7, %v1863_v27  ;;  %v1320_v32 = vpop.permute.xlu0 %1319  ;;  %v1331_v35 = vsel %vm389_vm5, %v1322_v34, 0  ;;  %v1438_v27 = vld [vmem:[#allocation2 + $0x8] sm:$0xff] }
 0x144   : > { %1246 = vmatprep.mubr.bf16.mxu0 %v1979_v40  ;;  %v1323_v33 = vsel %vm1321_vm15, %v1318_v30, %v1320_v32  ;;  %v1439_v32 = vld [vmem:[#allocation2 + $0x10] sm:$0xff] }
 0x145   : > { %1684 = vmatprep.subr.msk.bf16.mxu0 %vm389_vm5, %v1323_v33 }
 0x147   : > { %1640 = vmatmul.mubr.msk.bf16.vlgmr.msra.gmra.mrb[0].mxu1 %vm382_vm7, %v1864_v31 }
 0x148   : > { %1692 = vmatpush1.bf16.msra.mxu1 %v2153_v26  ;;  %782 = vmatprep.mubr.bf16.mxu1 %v1979_v40  ;;  %v1868_v26 = vld [vmem:[%s2352_s2 + $0x48] sm:$0xff]  }
 0x14b   : > { %1676 = vmatmul.mubr.msk.bf16.vlgmr.msra.gmra.mrb[0].mxu0 %vm382_vm7, %v1865_v29  ;;  %v1440_v29 = vld [vmem:[#allocation2 + $0x18] sm:$0xff] }
 0x14c   : > { %1337 = vmatpush1.bf16.msra.mxu0 %v1331_v35  ;;  %1256 = vmatprep.mubr.bf16.mxu0 %v1979_v40 }
 0x14f   : > { %1641 = vmatmul.mubr.msk.bf16.gmra.mrb[4].mxu1 %vm382_vm7, %v1866_v36 }
 0x150   : > { %897 = vmatprep.mubr.bf16.mxu1 %v1979_v40 }
 0x152   : > { %v1404_v45 = vpop.permute.xlu1 %1403 }
 0x153   : > { %1677 = vmatmul.mubr.msk.bf16.gmra.mrb[4].mxu0 %vm382_vm7, %v1867_v37 }
 0x154   : > { %1368 = vmatprep.mubr.bf16.mxu0 %v1979_v40  ;;  %v1409_v46 = vpop.permute.xlu0 %1408 }
 0x156   : > { %v1414_v63 = vpop.permute.xlu1 %1413 }
 0x15a   : > { %v1419_v14 = vpop.permute.xlu1 %1418 }
 0x15b   : > { %1650 = vmatmul.mubr.msk.bf16.vlgmr.msra.gmra.mrb[4].mxu1 %vm382_vm7, %v1868_v26  ;;  %1685 = vmatmul.mubr.msk.bf16.vlgmr.msra.gmra.mrb[0].mxu0 %vm382_vm7, %v1869_v38 }
 0x15c   : > { %1378 = vmatprep.mubr.bf16.mxu0 %v1979_v40 }
 0x163   : > { %1686 = vmatmul.mubr.msk.bf16.gmra.mrb[4].mxu0 %vm382_vm7, %v1870_v39  ;;  %v1986_v39 = vmov (!%p1687_p1), 0  }
 0x164   : > { %1872 = vset.pattern.permute.xlu1 (!%p1687_p1), %v1986_v39  ;;  %1871 = vset.pattern.permute.xlu0 (!%p1687_p1), %v1986_v39 }
 0x21a   : > { %v774_v41 = vpop.f32.mrb[0].mxu1 }
 0x21b   : > { %v776_v42 = vpop.f32.mrb[1].mxu1 }
 0x21c   : > { %v778_v43 = vpop.f32.mrb[2].mxu1 }
 0x21d   : > { %v780_v44 = vpop.f32.mrb[3].mxu1 }
 0x22e   : > { %v899_v47 = vpop.f32.mrb[4].mxu1  ;;  %v1370_v48 = vpop.f32.mrb[0].mxu0 }
 0x22f   : > { %v1693_v49 = vadd.f32 %v1370_v48, %v774_v41  ;;  %v901_v50 = vpop.f32.mrb[5].mxu1  ;;  %v1372_v51 = vpop.f32.mrb[1].mxu0  ;;  %v1474_v48 = vld [vmem:[%s2354_s4] sm:$0xff] (!%p1687_p1) }
 0x230   : > { %v1694_v52 = vadd.f32 %v1372_v51, %v776_v42  ;;  %v903_v23 = vpop.f32.mrb[6].mxu1  ;;  %v1374_v40 = vpop.f32.mrb[2].mxu0 }
 0x231   : > { %v1421_v53 = vadd.f32 %v1693_v49, %v1404_v45  ;;  %v1695_v54 = vadd.f32 %v1374_v40, %v778_v43  ;;  %v905_v55 = vpop.f32.mrb[7].mxu1  ;;  %v1376_v56 = vpop.f32.mrb[3].mxu0  ;;  %v1475_v49 = vld [vmem:[%s2354_s4 + $0x8] sm:$0xff] (!%p1687_p1)  ;;  %v1477_v40 = vld [vmem:[%s2354_s4 + $0x18] sm:$0xff] (!%p1687_p1) }
 0x232   : > { %v1422_v57 = vadd.f32 %v1694_v52, %v1404_v45  ;;  %v1696_v58 = vadd.f32 %v1376_v56, %v780_v44 }
 0x233   : > { %v1429_v59 = vmax.f32 %v1421_v53, 0.0  ;;  %v1423_v60 = vadd.f32 %v1695_v54, %v1409_v46 }
 0x234   : > { %v1430_v61 = vmax.f32 %v1422_v57, 0.0  ;;  %v1424_v62 = vadd.f32 %v1696_v58, %v1409_v46 }
 0x235   : > { %v1431_v0 = vmax.f32 %v1423_v60, 0.0 }
 0x236   : > { %v1432_v1 = vmax.f32 %v1424_v62, 0.0  ;;  %v1380_v2 = vpop.f32.mrb[4].mxu0  ;;  %v1441_v3 = vadd.f32 %v1430_v61, %v1429_v59 }
 0x237   : > { %v1697_v4 = vadd.f32 %v1380_v2, %v899_v47  ;;  %v1382_v5 = vpop.f32.mrb[5].mxu0 }
 0x238   : > { %v1698_v6 = vadd.f32 %v1382_v5, %v901_v50  ;;  %v1384_v7 = vpop.f32.mrb[6].mxu0  ;;  %1442 = vadd.xlane.f32.xlu0 %v1441_v3  ;;  %v1444_v8 = vadd.f32 %v1432_v1, %v1431_v0  ;;  %v1476_v50 = vld [vmem:[%s2354_s4 + $0x10] sm:$0xff] (!%p1687_p1)  ;;  %v1511_v0 = vld [vmem:[%s2355_s5] sm:$0x1] (!%p1687_p1) }
 0x239   : > { %v1425_v9 = vadd.f32 %v1697_v4, %v1414_v63  ;;  %v1699_v10 = vadd.f32 %v1384_v7, %v903_v23  ;;  %v1386_v11 = vpop.f32.mrb[7].mxu0 }
 0x23a   : > { %v1426_v12 = vadd.f32 %v1698_v6, %v1414_v63  ;;  %v1700_v13 = vadd.f32 %v1386_v11, %v905_v55  ;;  %1445 = vadd.xlane.f32.xlu1 %v1444_v8 }
 0x23b   : > { %v1433_v15 = vmax.f32 %v1425_v9, 0.0  ;;  %v1427_v16 = vadd.f32 %v1699_v10, %v1419_v14 }
 0x23c   : > { %v1434_v17 = vmax.f32 %v1426_v12, 0.0  ;;  %v1428_v18 = vadd.f32 %v1700_v13, %v1419_v14 }
 0x23d   : > { %v1435_v19 = vmax.f32 %v1427_v16, 0.0 }
 0x23e   : > { %v1436_v20 = vmax.f32 %v1428_v18, 0.0  ;;  %v1447_v21 = vadd.f32 %v1434_v17, %v1433_v15 }
 0x240   : > { %1448 = vadd.xlane.f32.xlu0 %v1447_v21  ;;  %v1450_v22 = vadd.f32 %v1436_v20, %v1435_v19 }
 0x244   : > { %1451 = vadd.xlane.f32.xlu0 %v1450_v22 }
 0x2c5   : > { %v1443_v25 = vpop.xlane.xlu0 %1442 }
 0x2c6   : > { %v1453_v28 = vadd.f32 %v1443_v25, %v1437_v24 }
 0x2c7   : > { %v1446_v30 = vpop.xlane.xlu1 %1445 }
 0x2c8   : > { %1458 = vst.msk [vmem:[#allocation2] sm:$0xff] %vm1457_vm0, %v1453_v28  ;;  %v1454_v31 = vadd.f32 %v1446_v30, %v1438_v27 }
 0x2ca   : > { %1459 = vst.msk [vmem:[#allocation2 + $0x8] sm:$0xff] %vm1457_vm0, %v1454_v31 }
 0x2cd   : > { %v1449_v33 = vpop.xlane.xlu0 %1448 }
 0x2ce   : > { %v1455_v34 = vadd.f32 %v1449_v33, %v1439_v32  ;;  %1465 = sbr.rel (%p1687_p1) target bundleno = 881 (0x371), region = 52 }
 0x2cf   : > { %v1466_v26 = vld [vmem:[#allocation2] sm:$0xff] (!%p1687_p1) }
 0x2d0   : > { %1460 = vst.msk [vmem:[#allocation2 + $0x10] sm:$0xff] %vm1457_vm0, %v1455_v34  ;;  %v1470_v42 = vmul.f32 (!%p1687_p1), 0.00048828125, %v1466_v26 }
 0x2d1   : > { %v1452_v35 = vpop.xlane.xlu0 %1451  ;;  %v1467_v43 = vld [vmem:[#allocation2 + $0x8] sm:$0xff] (!%p1687_p1) }
 0x2d2   : > { %v1456_v36 = vadd.f32 %v1452_v35, %v1440_v29  ;;  %1480 = vperm.xlu0 (!%p1687_p1), %1871, %v1470_v42   ;;  %v1471_v45 = vmul.f32 (!%p1687_p1), 0.00048828125, %v1467_v43 }
 0x2d4   : > { %1461 = vst.msk [vmem:[#allocation2 + $0x18] sm:$0xff] %vm1457_vm0, %v1456_v36 }
 0x2d6   : > { %1485 = vperm.xlu0 %1871, %v1471_v45  }
 0x2d7   : > { %v1468_v37 = vld [vmem:[#allocation2 + $0x10] sm:$0xff] }
 0x2d8   : > { %v1472_v41 = vmul.f32 0.00048828125, %v1468_v37 }
 0x2da   : > { %1490 = vperm.xlu1 %1872, %v1472_v41  }
 0x2db   : > { %v1469_v38 = vld [vmem:[#allocation2 + $0x18] sm:$0xff] }
 0x2dc   : > { %v1473_v44 = vmul.f32 0.00048828125, %v1469_v38 }
 0x2de   : > { %1495 = vperm.xlu1 %1872, %v1473_v44  }
 0x351   : > { %v1481_v47 = vpop.permute.xlu0 %1480 }
 0x352   : > { %v1498_v52 = vmul.f32 %v1481_v47, %v1474_v48 }
 0x355   : > { %v1486_v51 = vpop.permute.xlu0 %1485 }
 0x356   : > { %v1499_v23 = vmul.f32 %v1486_v51, %v1475_v49 }
 0x358   : > { %v1502_v55 = vadd.f32 %v1499_v23, %v1498_v52 }
 0x359   : > { %v1491_v46 = vpop.permute.xlu1 %1490 }
 0x35a   : > { %v1500_v54 = vmul.f32 %v1491_v46, %v1476_v50 }
 0x35c   : > { %v1503_v57 = vadd.f32 %v1502_v55, %v1500_v54 }
 0x35d   : > { %v1496_v53 = vpop.permute.xlu1 %1495 }
 0x35e   : > { %v1501_v56 = vmul.f32 %v1496_v53, %v1477_v40 }
 0x360   : > { %v1504_v58 = vadd.f32 %v1503_v57, %v1501_v56 }
 0x362   : > { %v1505_v59 = vrot.slane %v1504_v58, 4 }
 0x364   : > { %v1506_v60 = vadd.f32 %v1505_v59, %v1504_v58 }
 0x366   : > { %v1507_v61 = vrot.slane %v1506_v60, 2 }
 0x368   : > { %v1508_v62 = vadd.f32 %v1507_v61, %v1506_v60 }
 0x36a   : > { %v1509_v63 = vrot.slane %v1508_v62, 1 }
 0x36c   : > { %v1510_v1 = vadd.f32 %v1509_v63, %v1508_v62 }
 0x36e   : > { %v1512_v2 = vadd.f32 %v1511_v0, %v1510_v1 }
 0x370   : > { %1513 = vst [vmem:[%s2104_s12] sm:$0x1] %v1512_v2 }
 0x371 PF: > { %s1688_s29 = sshll.u32 %s1955_s25, 4  ;;  %s1527_s16 = sshll.u32 %s2104_s12, 4  ;;  %s1528_s16 = int_to_ptr.vmem [resolvable:$true] %s1527_s16 }
 0x372   : > { %s2300_s15 = scalar_lea.hbm %s2356_s6, %s1688_s29  ;;  %s1515_s17 = scalar_lea.sflag [#allocation4], %s264_s14 }
 0x373   : > { %s1873_s18 = scalar_lea.vmem %s1528_s16, 16  ;;  %s1987_s19 = smov [#allocation3]  }
 0x374   : > { %p1874_p2 = scmp.ne.s32.totalorder %s1528_s16, %s1873_s18  ;;  %s1877_s20 = sshll.u32 %s1987_s19, 4  ;;  %s1878_s20 = int_to_ptr.vmem [resolvable:$false] %s1877_s20 }
 0x375   : > { %s1879_s11 = scalar_lea.vmem %s1878_s20, 32  ;;  %p1880_p6 = scmp.lt.s32.totalorder %s1528_s16, %s1878_s20 }
 0x376   : > { %p1875_p4 = pnand %p1874_p2, %p2072_p3  ;;  %p1881_p7 = scmp.lt.s32.totalorder %s1879_s11, %s1873_s18 }
 0x378   : > { %p1876_p5 = pneg %p1875_p4  ;;  %p1882_p8 = por %p1881_p7, %p1880_p6 }
 0x37a   : > { %p1883_p10 = pnand %p1882_p8, %p1876_p5 }
 0x37c   : > { %1886 = shalt.err (!%p1883_p10)
}
 0x37d   : > { %s1887_s25 = scalar_lea.hbm %s2300_s15, 16  ;;  %s1891_s29 = scalar_lea.hbm %s2356_s6, 32 }
 0x37e   : > { %p1888_p11 = scmp.ne.s32.totalorder %s2300_s15, %s1887_s25  ;;  %p1892_p0 = scmp.lt.u32.totalorder %s2300_s15, %s2356_s6 }
 0x37f   : > { %p1893_p1 = scmp.lt.u32.totalorder %s1891_s29, %s1887_s25  ;;  %p1895_p4 = scmp.lt.u32.totalorder %s1887_s25, %s2300_s15 }
 0x380   : > { %p1889_p12 = pnand %p1888_p11, %p2072_p3 }
 0x381   : > { %p1894_p2 = por %p1893_p1, %p1892_p0 }
 0x382   : > { %p1890_p13 = pneg %p1889_p12 }
 0x383   : > { %p1896_p5 = por %p1895_p4, %p1894_p2 }
 0x385   : > { %p1897_p6 = pnand %p1896_p5, %p1890_p13 }
 0x387   : > { %1900 = shalt.err (!%p1897_p6)
}
 0x388   : > { %1759 = dma.vmem_to_hbm [thread:$0]  (%p2072_p3), %s1528_s16, 16, %s2300_s15, %s1515_s17  }
 0x389 PF: > { %p1765_p7 = scmp.ge.s32.totalorder %s1967_s28, 2  ;;  %s1539_s18 = sand.u32 1, %s1939_s21  }
 0x38a   : > { %s1540_s19 = scalar_lea.sflag [#allocation4], %s1539_s18 }
 0x38b   : > { %p1762_p8 = pnand %p1765_p7, %p2082_p9 }
 0x38d   : > { %1934 = dma.done.wait (!%p1762_p8), %s1540_s19, 16  }
 0x38e   : > { %1936 = vsyncadd (!%p1762_p8), %s1540_s19, 4294967280  ;;  %s19_s28 = sadd.s32 1, %s1967_s28   ;;  %s2359_s21 = smov %s1943_s22 }
 0x38f   : > { %p16_p10 = scmp.ge.s32.totalorder %s19_s28, 18   ;;  %s2360_s22 = smov %s1947_s23 }
 0x390   : > { %s2361_s23 = smov %s2090_s13  ;;  %s2362_s24 = smov %s1959_s26 }
 0x391   : > { %s2363_s25 = smov %s1963_s27  ;;  %s2364_s26 = smov %s2367_s7 }
 0x392   : > { %s2365_s27 = smov %s2371_s8  ;;  %18 = sbr.rel (!%p16_p10) target bundleno = 5 (0x5), region = 95 }
 0x399   :  { %1544 = vsyncpa [#allocation4], 1 }
 0x39a   :  { %1546 = vsyncpa [#allocation4 + $0x1], 1 }

</bundles_post_ra>
